<compile_context>
chip_gen: v7x
topology: tpu7x:2x2x1
jax: 0.10.0
libtpu: 0.0.40
codegen_flags: <defaults>
</compile_context>

<pallas_src>
import numpy as np
import jax
import jax.numpy as jnp
from jax.experimental import pallas as pl
from jax.experimental.pallas import tpu as pltpu


def _round_up(a, b):
    return (a + b - 1) // b * b


def _cdiv(a, b):
    return (a + b - 1) // b


def basic_block_kernel(x_ref, w1_ref, w2_ref, b_ref, o_ref):
    # x_ref : (C, TM)   stored dtype (e.g. f32) -- cast to compute dtype in-kernel
    # w1_ref: (P, C)    compute dtype, BN1 scale folded in
    # w2_ref: (P, P)    compute dtype, BN2 scale folded in
    # b_ref : (2, P, 1) f32 packed biases (BN1, BN2)
    # o_ref : (P, TM)   output dtype
    x = x_ref[...]
    xc = x.astype(w1_ref.dtype)                                        # in-kernel cast

    # conv1 (1x1, BN1 scale folded) -> bias -> ReLU      (f32 MXU accumulation)
    h = jnp.dot(w1_ref[...], xc, preferred_element_type=jnp.float32)   # (P, TM) f32
    h = jnp.maximum(h + b_ref[0], 0.0)

    # conv2 (1x1, BN2 scale folded) -> bias
    y = jnp.dot(w2_ref[...], h.astype(w2_ref.dtype),
                preferred_element_type=jnp.float32)                    # (P, TM) f32

    # identity residual in the ORIGINAL dtype (stride=1, no downsample) + final ReLU
    y = y + b_ref[1] + x.astype(jnp.float32)
    o_ref[...] = jnp.maximum(y, 0.0).astype(o_ref.dtype)


def basic_block_1x1(x_nchw, w1, bn1, w2, bn2, *, tile_m=1024, eps=1e-5,
                    compute_dtype=jnp.bfloat16, out_dtype=None):
    """x_nchw: (N, C, H, W).  w1/w2: conv1x1 weights (out, in) (kernel dims squeezed).
    bn*: dict(gamma, beta, mean, var), each (P,).  Returns (N, P, H, W) in out_dtype
    (defaults to x's dtype)."""
    N, C, H, W = x_nchw.shape
    P = w1.shape[0]
    assert P == C, "identity path requires inplanes == planes (no downsample, stride=1)"

    if out_dtype is None:
        out_dtype = x_nchw.dtype

    # Fold eval-mode BN into the conv weights (per-output-channel scale) + a bias add.
    def fold(w, bn):
        scale = bn["gamma"].astype(jnp.float32) / jnp.sqrt(bn["var"].astype(jnp.float32) + eps)
        bias = bn["beta"].astype(jnp.float32) - bn["mean"].astype(jnp.float32) * scale
        return (w.astype(jnp.float32) * scale[:, None]).astype(compute_dtype), bias

    w1m, b1 = fold(w1, bn1)                          # (P, C), (P,)
    w2m, b2 = fold(w2, bn2)                          # (P, P), (P,)
    bias = jnp.stack([b1, b2]).reshape(2, P, 1).astype(jnp.float32)

    HW = H * W
    lane_hw = _round_up(HW, 128)

    in_sz = np.dtype(x_nchw.dtype).itemsize
    csz = np.dtype(compute_dtype).itemsize
    osz = np.dtype(out_dtype).itemsize

    # Per-generation VMEM budget: 75% of physical VMEM leaves headroom for compiler
    # scratch / DMA descriptors (~48 MiB on v7x, ~96 MiB on v5e/v6e).
    try:
        vmem_cap = int(pltpu.get_tpu_info().vmem_capacity_bytes)
    except Exception:
        vmem_cap = 64 * 1024 * 1024
    vmem_limit = int(0.75 * vmem_cap)

    def vmem_need(tm):
        # double-buffered x/out tiles + (single-buffered) weights/bias + f32 temps
        return (2 * tm * (C * in_sz + P * osz)
                + (C * P + P * P) * csz + 2 * P * 4
                + 3 * P * tm * 4)

    # Lane tile over pixels: multiple of 128, no larger than the (rounded) spatial size.
    tile_m = max(128, min(_round_up(int(tile_m), 128), lane_hw))
    # Shrink until the working set fits the scoped VMEM budget.
    while tile_m > 128 and vmem_need(tile_m) > vmem_limit:
        tile_m = max(128, _round_up(tile_m // 2, 128))
    # Guarantee >= 4 grid steps so v7x's two TensorCores both get work and the DMA
    # pipeline has iterations to overlap.
    while tile_m > 128 and N * _cdiv(HW, tile_m) < 4:
        tile_m = max(128, _round_up(tile_m // 2, 128))

    grid = (N, _cdiv(HW, tile_m))

    # Free, contiguous reshape only -- no cast, no pad, no post-kernel slice.
    x_flat = x_nchw.reshape(N, C, HW)

    cost = pl.CostEstimate(
        flops=2 * N * HW * P * (C + P),
        transcendentals=0,
        bytes_accessed=(N * C * HW * in_sz + N * P * HW * osz
                        + (C * P + P * P) * csz + 2 * P * 4),
    )

    def run(single_buffer_consts):
        ck = dict(pipeline_mode=pl.Buffered(1)) if single_buffer_consts else {}
        return pl.pallas_call(
            basic_block_kernel,
            out_shape=jax.ShapeDtypeStruct((N, P, HW), out_dtype),
            grid_spec=pltpu.PrefetchScalarGridSpec(
                num_scalar_prefetch=0,
                grid=grid,
                in_specs=[
                    pl.BlockSpec((None, C, tile_m), lambda n, m: (n, 0, m)),     # x tile (C, TM)
                    pl.BlockSpec((P, C), lambda n, m: (0, 0), **ck),             # w1 (BN1 folded)
                    pl.BlockSpec((P, P), lambda n, m: (0, 0), **ck),             # w2 (BN2 folded)
                    pl.BlockSpec((2, P, 1), lambda n, m: (0, 0, 0), **ck),       # packed biases
                ],
                out_specs=pl.BlockSpec((None, P, tile_m), lambda n, m: (n, 0, m)),
            ),
            compiler_params=pltpu.CompilerParams(
                dimension_semantics=("parallel", "parallel"),
                vmem_limit_bytes=vmem_limit,
            ),
            cost_estimate=cost,
        )(x_flat, w1m, w2m, bias)

    try:
        out_flat = run(True)    # constants single-buffered (VMEM headroom)
    except Exception:
        out_flat = run(False)   # fallback for jax builds without pipeline_mode support

    return out_flat.reshape(N, P, H, W)


def reference_forward(x_nchw, w1, bn1, w2, bn2, eps=1e-5):
    """Plain-JAX reference matching PyTorch eval-mode forward."""
    def bn(z, p):
        g = p["gamma"].reshape(1, -1, 1, 1)
        b = p["beta"].reshape(1, -1, 1, 1)
        m = p["mean"].reshape(1, -1, 1, 1)
        v = p["var"].reshape(1, -1, 1, 1)
        return (z - m) / jnp.sqrt(v + eps) * g + b

    def conv1x1(z, w):
        return jnp.einsum("nchw,pc->nphw", z, w)

    out = jnp.maximum(bn(conv1x1(x_nchw, w1), bn1), 0.0)
    out = bn(conv1x1(out, w2), bn2)
    out = out + x_nchw
    return jnp.maximum(out, 0.0)


if __name__ == "__main__":
    key = jax.random.PRNGKey(0)
    k_x, k_w1, k_w2, k_g1, k_b1, k_g2, k_b2, k_m1, k_v1, k_m2, k_v2 = jax.random.split(key, 11)

    N, C, H, W = 2, 4, 16, 16   # inplanes = planes = 4, stride = 1, downsample = None
    P = C

    x = jax.random.normal(k_x, (N, C, H, W), dtype=jnp.float32)

    # conv weights: PyTorch shape (out, in, 1, 1) -> stored squeezed as (out, in)
    w1 = jax.random.normal(k_w1, (P, C), dtype=jnp.float32) * 0.1
    w2 = jax.random.normal(k_w2, (P, P), dtype=jnp.float32) * 0.1

    bn1 = dict(
        gamma=1.0 + 0.1 * jax.random.normal(k_g1, (P,), dtype=jnp.float32),
        beta=0.1 * jax.random.normal(k_b1, (P,), dtype=jnp.float32),
        mean=0.1 * jax.random.normal(k_m1, (P,), dtype=jnp.float32),
        var=jnp.abs(jax.random.normal(k_v1, (P,), dtype=jnp.float32)) + 0.5,
    )
    bn2 = dict(
        gamma=1.0 + 0.1 * jax.random.normal(k_g2, (P,), dtype=jnp.float32),
        beta=0.1 * jax.random.normal(k_b2, (P,), dtype=jnp.float32),
        mean=0.1 * jax.random.normal(k_m2, (P,), dtype=jnp.float32),
        var=jnp.abs(jax.random.normal(k_v2, (P,), dtype=jnp.float32)) + 0.5,
    )

    ref = jax.block_until_ready(reference_forward(x, w1, bn1, w2, bn2))

    # f32 compute path: near bit-accurate vs reference (identity is exact f32 now).
    out_f32 = jax.block_until_ready(
        basic_block_1x1(x, w1, bn1, w2, bn2, compute_dtype=jnp.float32))
    assert out_f32.shape == (N, P, H, W)
    assert jnp.allclose(out_f32, ref, atol=1e-4, rtol=1e-4), "f32 kernel mismatch vs reference"

    # Default bf16 matmul path (f32 accumulation, f32 residual): loose tolerance.
    out_bf16 = jax.block_until_ready(basic_block_1x1(x, w1, bn1, w2, bn2))
    assert out_bf16.shape == (N, P, H, W)
    assert jnp.allclose(out_bf16, ref, atol=5e-2, rtol=5e-2), "bf16 kernel mismatch vs reference"

    # bf16-output knob (cuts store traffic when the consumer accepts bf16).
    out_bf16o = jax.block_until_ready(
        basic_block_1x1(x, w1, bn1, w2, bn2, out_dtype=jnp.bfloat16))
    assert out_bf16o.dtype == jnp.bfloat16 and out_bf16o.shape == (N, P, H, W)
    assert jnp.allclose(out_bf16o.astype(jnp.float32), ref, atol=1e-1, rtol=5e-2), \
        "bf16-output kernel mismatch vs reference"

    print("KERNEL_OK")
</pallas_src>

<mosaic_0001>
module attributes {stable_mosaic.version = 11 : i64} {
  func.func @basic_block_kernel(%arg0: i32, %arg1: i32, %arg2: memref<1x4x128xf32, #tpu.memory_space<vmem>>, %arg3: memref<4x4xf32, #tpu.memory_space<vmem>>, %arg4: memref<4x4xf32, #tpu.memory_space<vmem>>, %arg5: memref<2x4x1xf32, #tpu.memory_space<vmem>>, %arg6: memref<1x4x128xf32, #tpu.memory_space<vmem>>) attributes {dimension_semantics = [#tpu.dimension_semantics<parallel>, #tpu.dimension_semantics<parallel>], iteration_bounds = array<i64: 2, 2>, scalar_prefetch = 0 : i64, scratch_operands = 0 : i64, tpu.core_type = #tpu.core_type<tc>, window_params = [{transform_indices = @transform_0, window_bounds = array<i64: 1, 4, 128>}, {pipeline_mode = #tpu.pipeline_mode<synchronous>, transform_indices = @transform_1, window_bounds = array<i64: 4, 4>}, {pipeline_mode = #tpu.pipeline_mode<synchronous>, transform_indices = @transform_2, window_bounds = array<i64: 4, 4>}, {pipeline_mode = #tpu.pipeline_mode<synchronous>, transform_indices = @transform_3, window_bounds = array<i64: 2, 4, 1>}, {transform_indices = @transform_4, window_bounds = array<i64: 1, 4, 128>}]} {
    %c0 = arith.constant 0 : index
    %c0_0 = arith.constant 0 : index
    %c0_1 = arith.constant 0 : index
    %0 = vector.load %arg2[%c0, %c0_0, %c0_1] : memref<1x4x128xf32, #tpu.memory_space<vmem>>, vector<1x4x128xf32>
    %1 = vector.shape_cast %0 : vector<1x4x128xf32> to vector<4x128xf32>
    %c0_2 = arith.constant 0 : index
    %c0_3 = arith.constant 0 : index
    %2 = vector.load %arg3[%c0_2, %c0_3] : memref<4x4xf32, #tpu.memory_space<vmem>>, vector<4x4xf32>
    %cst = arith.constant dense<0.000000e+00> : vector<4x128xf32>
    %3 = tpu.matmul %2, %1, %cst {dimension_numbers = #tpu.dot_dimension_numbers<[1], [0], [0], [1], [0, 0, 1, 1], [], []>} : vector<4x4xf32>, vector<4x128xf32>, vector<4x128xf32> -> vector<4x128xf32>
    %c0_4 = arith.constant 0 : index
    %c0_5 = arith.constant 0 : index
    %c0_6 = arith.constant 0 : index
    %4 = vector.load %arg5[%c0_4, %c0_5, %c0_6] : memref<2x4x1xf32, #tpu.memory_space<vmem>>, vector<1x4x1xf32>
    %5 = vector.shape_cast %4 : vector<1x4x1xf32> to vector<4x1xf32>
    %6 = vector.broadcast %5 : vector<4x1xf32> to vector<4x128xf32>
    %7 = arith.addf %3, %6 : vector<4x128xf32>
    %cst_7 = arith.constant 0.000000e+00 : f32
    %8 = vector.broadcast %cst_7 : f32 to vector<4x128xf32>
    %9 = arith.maximumf %7, %8 : vector<4x128xf32>
    %c0_8 = arith.constant 0 : index
    %c0_9 = arith.constant 0 : index
    %10 = vector.load %arg4[%c0_8, %c0_9] : memref<4x4xf32, #tpu.memory_space<vmem>>, vector<4x4xf32>
    %cst_10 = arith.constant dense<0.000000e+00> : vector<4x128xf32>
    %11 = tpu.matmul %10, %9, %cst_10 {dimension_numbers = #tpu.dot_dimension_numbers<[1], [0], [0], [1], [0, 0, 1, 1], [], []>} : vector<4x4xf32>, vector<4x128xf32>, vector<4x128xf32> -> vector<4x128xf32>
    %c1 = arith.constant 1 : index
    %c0_11 = arith.constant 0 : index
    %c0_12 = arith.constant 0 : index
    %12 = vector.load %arg5[%c1, %c0_11, %c0_12] : memref<2x4x1xf32, #tpu.memory_space<vmem>>, vector<1x4x1xf32>
    %13 = vector.shape_cast %12 : vector<1x4x1xf32> to vector<4x1xf32>
    %14 = vector.broadcast %13 : vector<4x1xf32> to vector<4x128xf32>
    %15 = arith.addf %11, %14 : vector<4x128xf32>
    %16 = arith.addf %15, %1 : vector<4x128xf32>
    %cst_13 = arith.constant 0.000000e+00 : f32
    %17 = vector.broadcast %cst_13 : f32 to vector<4x128xf32>
    %18 = arith.maximumf %16, %17 : vector<4x128xf32>
    %c0_14 = arith.constant 0 : index
    %c0_15 = arith.constant 0 : index
    %c0_16 = arith.constant 0 : index
    %19 = vector.load %arg6[%c0_14, %c0_15, %c0_16] : memref<1x4x128xf32, #tpu.memory_space<vmem>>, vector<1x4x128xf32>
    %20 = vector.shape_cast %19 : vector<1x4x128xf32> to vector<4x128xf32>
    %21 = vector.shape_cast %18 : vector<4x128xf32> to vector<1x4x128xf32>
    tpu.vector_store %arg6[%c0_14, %c0_15, %c0_16], %21 {strides = array<i32>} : memref<1x4x128xf32, #tpu.memory_space<vmem>>, vector<1x4x128xf32>,
    return
  }
  func.func @transform_0(%arg0: i32, %arg1: i32) -> (i32, i32, i32) {
    %c0_i32 = arith.constant 0 : i32
    %c0_i32_0 = arith.constant 0 : i32
    return %arg0, %c0_i32, %arg1 : i32, i32, i32
  }
  func.func @transform_1(%arg0: i32, %arg1: i32) -> (i32, i32) {
    %c0_i32 = arith.constant 0 : i32
    %c0_i32_0 = arith.constant 0 : i32
    %c0_i32_1 = arith.constant 0 : i32
    return %c0_i32, %c0_i32_0 : i32, i32
  }
  func.func @transform_2(%arg0: i32, %arg1: i32) -> (i32, i32) {
    %c0_i32 = arith.constant 0 : i32
    %c0_i32_0 = arith.constant 0 : i32
    %c0_i32_1 = arith.constant 0 : i32
    return %c0_i32, %c0_i32_0 : i32, i32
  }
  func.func @transform_3(%arg0: i32, %arg1: i32) -> (i32, i32, i32) {
    %c0_i32 = arith.constant 0 : i32
    %c0_i32_0 = arith.constant 0 : i32
    %c0_i32_1 = arith.constant 0 : i32
    %c0_i32_2 = arith.constant 0 : i32
    return %c0_i32, %c0_i32_0, %c0_i32_1 : i32, i32, i32
  }
  func.func @transform_4(%arg0: i32, %arg1: i32) -> (i32, i32, i32) {
    %c0_i32 = arith.constant 0 : i32
    %c0_i32_0 = arith.constant 0 : i32
    return %arg0, %c0_i32, %arg1 : i32, i32, i32
  }
}

module attributes {stable_mosaic.version = 11 : i64} {
  func.func @basic_block_kernel(%arg0: i32, %arg1: i32, %arg2: memref<1x4x128xf32, #tpu.memory_space<vmem>>, %arg3: memref<4x4xf32, #tpu.memory_space<vmem>>, %arg4: memref<4x4xf32, #tpu.memory_space<vmem>>, %arg5: memref<2x4x1xf32, #tpu.memory_space<vmem>>, %arg6: memref<1x4x128xf32, #tpu.memory_space<vmem>>) attributes {dimension_semantics = [#tpu.dimension_semantics<parallel>, #tpu.dimension_semantics<parallel>], iteration_bounds = array<i64: 2, 2>, scalar_prefetch = 0 : i64, scratch_operands = 0 : i64, tpu.core_type = #tpu.core_type<tc>, window_params = [{transform_indices = @transform_0, window_bounds = array<i64: 1, 4, 128>}, {pipeline_mode = #tpu.pipeline_mode<synchronous>, transform_indices = @transform_1, window_bounds = array<i64: 4, 4>}, {pipeline_mode = #tpu.pipeline_mode<synchronous>, transform_indices = @transform_2, window_bounds = array<i64: 4, 4>}, {pipeline_mode = #tpu.pipeline_mode<synchronous>, transform_indices = @transform_3, window_bounds = array<i64: 2, 4, 1>}, {transform_indices = @transform_4, window_bounds = array<i64: 1, 4, 128>}]} {
    %c0 = arith.constant 0 : index
    %c0_0 = arith.constant 0 : index
    %c0_1 = arith.constant 0 : index
    %0 = vector.load %arg2[%c0, %c0_0, %c0_1] : memref<1x4x128xf32, #tpu.memory_space<vmem>>, vector<1x4x128xf32>
    %1 = vector.shape_cast %0 : vector<1x4x128xf32> to vector<4x128xf32>
    %c0_2 = arith.constant 0 : index
    %c0_3 = arith.constant 0 : index
    %2 = vector.load %arg3[%c0_2, %c0_3] : memref<4x4xf32, #tpu.memory_space<vmem>>, vector<4x4xf32>
    %cst = arith.constant dense<0.000000e+00> : vector<4x128xf32>
    %3 = tpu.matmul %2, %1, %cst {dimension_numbers = #tpu.dot_dimension_numbers<[1], [0], [0], [1], [0, 0, 1, 1], [], []>} : vector<4x4xf32>, vector<4x128xf32>, vector<4x128xf32> -> vector<4x128xf32>
    %c0_4 = arith.constant 0 : index
    %c0_5 = arith.constant 0 : index
    %c0_6 = arith.constant 0 : index
    %4 = vector.load %arg5[%c0_4, %c0_5, %c0_6] : memref<2x4x1xf32, #tpu.memory_space<vmem>>, vector<1x4x1xf32>
    %5 = vector.shape_cast %4 : vector<1x4x1xf32> to vector<4x1xf32>
    %6 = vector.broadcast %5 : vector<4x1xf32> to vector<4x128xf32>
    %7 = arith.addf %3, %6 : vector<4x128xf32>
    %cst_7 = arith.constant 0.000000e+00 : f32
    %8 = vector.broadcast %cst_7 : f32 to vector<4x128xf32>
    %9 = arith.maximumf %7, %8 : vector<4x128xf32>
    %c0_8 = arith.constant 0 : index
    %c0_9 = arith.constant 0 : index
    %10 = vector.load %arg4[%c0_8, %c0_9] : memref<4x4xf32, #tpu.memory_space<vmem>>, vector<4x4xf32>
    %cst_10 = arith.constant dense<0.000000e+00> : vector<4x128xf32>
    %11 = tpu.matmul %10, %9, %cst_10 {dimension_numbers = #tpu.dot_dimension_numbers<[1], [0], [0], [1], [0, 0, 1, 1], [], []>} : vector<4x4xf32>, vector<4x128xf32>, vector<4x128xf32> -> vector<4x128xf32>
    %c1 = arith.constant 1 : index
    %c0_11 = arith.constant 0 : index
    %c0_12 = arith.constant 0 : index
    %12 = vector.load %arg5[%c1, %c0_11, %c0_12] : memref<2x4x1xf32, #tpu.memory_space<vmem>>, vector<1x4x1xf32>
    %13 = vector.shape_cast %12 : vector<1x4x1xf32> to vector<4x1xf32>
    %14 = vector.broadcast %13 : vector<4x1xf32> to vector<4x128xf32>
    %15 = arith.addf %11, %14 : vector<4x128xf32>
    %16 = arith.addf %15, %1 : vector<4x128xf32>
    %cst_13 = arith.constant 0.000000e+00 : f32
    %17 = vector.broadcast %cst_13 : f32 to vector<4x128xf32>
    %18 = arith.maximumf %16, %17 : vector<4x128xf32>
    %c0_14 = arith.constant 0 : index
    %c0_15 = arith.constant 0 : index
    %c0_16 = arith.constant 0 : index
    %19 = vector.load %arg6[%c0_14, %c0_15, %c0_16] : memref<1x4x128xf32, #tpu.memory_space<vmem>>, vector<1x4x128xf32>
    %20 = vector.shape_cast %19 : vector<1x4x128xf32> to vector<4x128xf32>
    %21 = vector.shape_cast %18 : vector<4x128xf32> to vector<1x4x128xf32>
    tpu.vector_store %arg6[%c0_14, %c0_15, %c0_16], %21 {strides = array<i32>} : memref<1x4x128xf32, #tpu.memory_space<vmem>>, vector<1x4x128xf32>,
    return
  }
  func.func @transform_0(%arg0: i32, %arg1: i32) -> (i32, i32, i32) {
    %c0_i32 = arith.constant 0 : i32
    %c0_i32_0 = arith.constant 0 : i32
    return %arg0, %c0_i32, %arg1 : i32, i32, i32
  }
  func.func @transform_1(%arg0: i32, %arg1: i32) -> (i32, i32) {
    %c0_i32 = arith.constant 0 : i32
    %c0_i32_0 = arith.constant 0 : i32
    %c0_i32_1 = arith.constant 0 : i32
    return %c0_i32, %c0_i32_0 : i32, i32
  }
  func.func @transform_2(%arg0: i32, %arg1: i32) -> (i32, i32) {
    %c0_i32 = arith.constant 0 : i32
    %c0_i32_0 = arith.constant 0 : i32
    %c0_i32_1 = arith.constant 0 : i32
    return %c0_i32, %c0_i32_0 : i32, i32
  }
  func.func @transform_3(%arg0: i32, %arg1: i32) -> (i32, i32, i32) {
    %c0_i32 = arith.constant 0 : i32
    %c0_i32_0 = arith.constant 0 : i32
    %c0_i32_1 = arith.constant 0 : i32
    %c0_i32_2 = arith.constant 0 : i32
    return %c0_i32, %c0_i32_0, %c0_i32_1 : i32, i32, i32
  }
  func.func @transform_4(%arg0: i32, %arg1: i32) -> (i32, i32, i32) {
    %c0_i32 = arith.constant 0 : i32
    %c0_i32_0 = arith.constant 0 : i32
    return %arg0, %c0_i32, %arg1 : i32, i32, i32
  }
}

</mosaic_0001>

<bundles_post_ra>
// kernel: tpu_custom_call.1
= control target key start
LH: loop header
LB: loop body
LE: loop exit
PB: predicated region body
PF: predicated region fallthrough
CT: control target
= control target key end

     0   :  { %9 = vsyncpa [#allocation3], 0  ;;  %s996_s0 = inlined_call_operand.hbm [shape: f32[2,4,256], index: 0, kind: input, shape index: {}]   ;;  %s997_s1 = inlined_call_operand.vmem [shape: f32[4,4], index: 1, kind: input, shape index: {}]   ;;  %s998_s2 = inlined_call_operand.vmem [shape: f32[4,4], index: 2, kind: input, shape index: {}]   ;;  %s999_s3 = inlined_call_operand.vmem [shape: f32[2,4,1], index: 3, kind: input, shape index: {}]   ;;  %s1000_s4 = inlined_call_operand.hbm [shape: f32[2,4,256], index: 4, kind: output, shape index: {}]  }
   0x1   :  { %11 = vsyncpa [#allocation3 + $0x1], 0 }
   0x2   :  { %12 = vsyncpa [#allocation4], 0 }
   0x3   :  { %14 = vsyncpa [#allocation4 + $0x1], 0  ;;  %s782_s15 = smov 0   ;;  %s784_s16 = smov 0  }
   0x4   :  { %s786_s17 = smov 0   ;;  %s788_s18 = smov 0  }
   0x5   :  { %s790_s19 = smov 0   ;;  %s792_s20 = smov 0  }
   0x6   :  { %s794_s21 = smov 0   ;;  %s796_s22 = smov 0  }
   0x7 LB: > { %s506_s23 = sadd.s32 4294967295, %s750_s22   ;;  %s507_s24 = sadd.s32 4294967294, %s750_s22   ;;  %s750_s22 = sphi %s796_s22, %s20_s22   ;;  %s746_s21 = sphi %s794_s21, %s1020_s21   ;;  %s742_s20 = sphi %s792_s20, %s1019_s20   ;;  %s738_s19 = sphi %s790_s19, %s1018_s19   ;;  %s734_s18 = sphi %s788_s18, %s1017_s18   ;;  %s730_s17 = sphi %s786_s17, %s1016_s17   ;;  %s726_s16 = sphi %s784_s16, %s1015_s16   ;;  %s722_s15 = sphi %s782_s15, %s1014_s15  }
   0x8   : > { %s29_s25 = sadd.s32 1, %s742_s20  ;;  %s32_s26 = sadd.s32 1, %s746_s21 }
   0x9   : > { %p30_p0 = scmp.ge.s32.totalorder %s29_s25, 2  ;;  %s41_s27 = sadd.s32 1, %s730_s17 }
   0xa   : > { %p48_p1 = scmp.ne.s32.totalorder %s730_s17, %s726_s16  ;;  %p49_p2 = scmp.eq.s32.totalorder %s750_s22, 0 }
   0xb   : > { %s1022_s25 = smov (%p30_p0, %s29_s25), 0  ;;  %s1024_s26 = smov (!%p30_p0, %s32_s26), %s746_s21 }
   0xc   : > { %s37_s28 = ssub.s32 %s742_s20, %s1022_s25  ;;  %p835_p3 = por %p49_p2, %p48_p1 }
   0xd   : > { %p34_p4 = scmp.ge.s32.totalorder %s1024_s26, 2  ;;  %p54_p5 = scmp.ne.s32.totalorder %s726_s16, %s722_s15 }
   0xe   : > { %p55_p6 = scmp.eq.s32.totalorder %s506_s23, 0  ;;  %p143_p7 = scmp.eq.s32.totalorder %s506_s23, 3 }
   0xf   : > { %s1026_s26 = smov (%p34_p4, %s1024_s26), 0  ;;  %p149_p10 = scmp.eq.s32.totalorder %s507_s24, 3 }
  0x10   : > { %1004 = sst [smem:[#allocation8_spill]] %s1026_s26  ;;  %p843_p8 = por %p55_p6, %p54_p5 }
  0x11   : > { %p847_p9 = por %p143_p7, %p48_p1  ;;  %s36_s6 = ssub.s32 %s746_s21, %s1026_s26 }
  0x12   : > { %s38_s7 = sor.u32 %s37_s28, %s36_s6  ;;  %p853_p12 = por %p149_p10, %p54_p5 }
  0x13   : > { %s1006_s5 = scalar_select %p847_p9, 1, 0 }
  0x14   : > { %p39_p11 = scmp.eq.s32.totalorder %s38_s7, 0  ;;  %p552_p13 = scmp.lt.s32.totalorder %s750_s22, 4 }
  0x15   : > { %s1007_s8 = scalar_select %p853_p12, 1, 0 }
  0x16   : > { %s178_s9 = sand.u32 1, %s730_s17   ;;  %s511_s12 = sshll.u32 %s746_s21, 1 }
  0x17   : > { %s860_s10 = scalar_select %p39_p11, %s730_s17, %s41_s27  }
  0x18   : > { %s510_s11 = sshll.u32 %s178_s9, 2  ;;  %s187_s13 = sadd.s32 %s742_s20, %s511_s12 }
  0x19   : > { %s182_s14 = scalar_lea.vmem [#allocation2], %s510_s11  ;;  %s512_s26 = sshll.u32 %s187_s13, 6 }
  0x1a   : > { %s191_s23 = sshll.u32 %s182_s14, 4  ;;  %s869_s6 = scalar_lea.hbm %s996_s0, %s512_s26  ;;  %s864_s23 = int_to_ptr.vmem [resolvable:$true] %s191_s23 }
  0x1b   : > { %p873_p0 = pnand %p552_p13, %p835_p3  ;;  %s179_s7 = scalar_lea.sflag [#allocation3], %s178_s9 }
  0x1c   : > { %s622_s11 = scalar_lea.hbm %s869_s6, 64  ;;  %s627_s12 = scalar_lea.hbm %s996_s0, 256 }
  0x1d   : > { %p623_p4 = scmp.ne.s32.totalorder %s869_s6, %s622_s11  ;;  %p624_p5 = pneg %p873_p0 }
  0x1e   : > { %p628_p3 = scmp.lt.u32.totalorder %s869_s6, %s996_s0  ;;  %p629_p10 = scmp.lt.u32.totalorder %s627_s12, %s622_s11 }
  0x1f   : > { %p625_p6 = pnand %p624_p5, %p623_p4  ;;  %p631_p13 = scmp.lt.u32.totalorder %s622_s11, %s869_s6 }
  0x20   : > { %p630_p11 = por %p629_p10, %p628_p3 }
  0x21   : > { %p626_p7 = pneg %p625_p6 }
  0x22   : > { %p632_p1 = por %p631_p13, %p630_p11 }
  0x24   : > { %p633_p2 = pnand %p632_p1, %p626_p7 }
  0x26   : > { %636 = shalt.err (!%p633_p2)
}
  0x27   : > { %s637_s9 = scalar_lea.vmem %s864_s23, 64  ;;  %s752_s24 = smov [#allocation2]  }
  0x28   : > { %p638_p4 = scmp.ne.s32.totalorder %s864_s23, %s637_s9  ;;  %s642_s28 = sshll.u32 %s752_s24, 4  ;;  %s643_s28 = int_to_ptr.vmem [resolvable:$false] %s642_s28 }
  0x29   : > { %s644_s26 = scalar_lea.vmem %s643_s28, 128  ;;  %p645_p9 = scmp.lt.s32.totalorder %s864_s23, %s643_s28 }
  0x2a   : > { %p640_p6 = pnand %p638_p4, %p624_p5  ;;  %p646_p3 = scmp.lt.s32.totalorder %s644_s26, %s637_s9 }
  0x2c   : > { %p641_p12 = pneg %p640_p6  ;;  %p647_p10 = por %p646_p3, %p645_p9 }
  0x2e   : > { %p648_p11 = pnand %p647_p10, %p641_p12 }
  0x30   : > { %651 = shalt.err (!%p648_p11)
}
  0x31   : > { %547 = dma.hbm_to_vmem [thread:$0]  (!%p873_p0), %s869_s6, 64, %s864_s23, %s179_s7  }
  0x32   : > { %p1009_p1 = scmp.lt.s32.totalorder %s750_s22, 5  ;;  %p1010_p2 = scmp.ge.s32.totalorder %s750_s22, 1 }
  0x34   : > { %p197_p5 = pnand %p1010_p2, %p1009_p1 }
  0x35   : > { %s909_s11 = sand.u32 (!%p197_p5), 1, %s726_s16  }
  0x36   : > { %200 = sbr.rel (%p197_p5) target bundleno = 515 (0x203), region = 36  ;;  %s514_s29 = sshll.u32 (!%p197_p5), %s909_s11, 2 }
  0x37   : > { %s203_s12 = scalar_lea.sflag (!%p197_p5), [#allocation3], %s909_s11  ;;  %s206_s27 = scalar_lea.vmem (!%p197_p5), [#allocation2], %s514_s29 }
  0x3d   : > { %713 = dma.done.wait (%p843_p8), %s203_s12, 64  }
  0x3e   : > { %715 = vsyncadd (%p843_p8), %s203_s12, 4294967232  ;;  %v753_v0 = vmov 0.0   ;;  %vm754_vm0 = vmmov 0   ;;  %v755_v1 = vmov 0   ;;  %vm243_vm1 = vcmask 1043456   ;;  %s522_s28 = sshll.u32 %s738_s19, 1 }
  0x3f   : > { %530 = vmatprep.subr.mxu0 %v753_v0  ;;  %532 = vmatprep.mubr.msk.f32.mxu0 %vm754_vm0, %v753_v0  ;;  %vm239_vm2 = vcmask 31744   ;;  %v231_v2 = vld [vmem:[%s206_s27] sm:$0xf]  ;;  %s417_s26 = sadd.s32 %s734_s18, %s522_s28  ;;  %s230_s27 = scalar_lea.vmem [#allocation5], %s514_s29 }
  0x40   : > { %621 = vset.pattern.permute.xlu0 %v755_v1  ;;  %535 = vmatprep.subr.mxu1 %v753_v0  ;;  %v232_v3 = vld [vmem:[%s997_s1] sm:$0xf]  ;;  %v518_v5 = vld [vmem:[%s999_s3 + $0x4] sm:$0xf]  ;;  %s523_s12 = sshll.u32 %s417_s26, 6  ;;  %s421_s23 = sshll.u32 %s230_s27, 4  ;;  %s944_s23 = int_to_ptr.vmem [resolvable:$true] %s421_s23 }
  0x41   : > { %537 = vmatprep.mubr.msk.f32.mxu1 %vm754_vm0, %v753_v0  ;;  %v233_v4 = vld [vmem:[%s999_s3] sm:$0xf]  ;;  %531 = vmatpush3.msk.msra.mxu0 %vm243_vm1, %v231_v2  ;;  %s942_s13 = scalar_lea.hbm %s1000_s4, %s523_s12  ;;  %s406_s18 = scalar_lea.sflag [#allocation4], %s909_s11 }
  0x42   : > { %236 = vperm.xlu0 %621, %v233_v4   ;;  %533 = vmatmul.mubr.msk.f32.vlgmr.msra.gmra.mrb[0].mxu0 %vm239_vm2, %v232_v3  ;;  %v318_v11 = vld [vmem:[%s998_s2] sm:$0xf]  ;;  %s652_s19 = scalar_lea.vmem %s944_s23, 64  ;;  %p1011_p9 = scmp.ne.s32.totalorder %s1006_s5, 0 }
  0x43   : > { %p653_p8 = scmp.ne.s32.totalorder %s944_s23, %s652_s19  ;;  %s756_s29 = smov [#allocation5]  }
  0x44   : > { %s656_s30 = sshll.u32 %s756_s29, 4  ;;  %s657_s30 = int_to_ptr.vmem [resolvable:$false] %s656_s30 }
  0x45   : > { %p654_p12 = pnand %p653_p8, %p1011_p9  ;;  %s658_s14 = scalar_lea.vmem %s657_s30, 128 }
  0x46   : > { %323 = vperm.xlu0 %621, %v518_v5   ;;  %p659_p7 = scmp.lt.s32.totalorder %s944_s23, %s657_s30  ;;  %p660_p13 = scmp.lt.s32.totalorder %s658_s14, %s652_s19 }
  0x47   : > { %p655_p0 = pneg %p654_p12 }
  0x48   : > { %p661_p4 = por %p660_p13, %p659_p7 }
  0x4a   : > { %p662_p6 = pnand %p661_p4, %p655_p0 }
  0xc1   : > { %v237_v6 = vpop.permute.xlu0 %236 }
  0xc5   : > { %v324_v12 = vpop.permute.xlu0 %323 }
 0x115   : > { %v313_v7 = vpop.f32.mrb[0].mxu0 }
 0x116   : > { %v314_v8 = vadd.f32 %v313_v7, %v237_v6  ;;  %v534_v9 = vpop.f32.mrb[1].mxu0 }
 0x118   : > { %v317_v10 = vmax.f32 %v314_v8, 0.0 }
 0x11a   : > { %536 = vmatpush3.msk.msra.mxu1 %vm243_vm1, %v317_v10 }
 0x11b   : > { %538 = vmatmul.mubr.msk.f32.vlgmr.msra.gmra.mrb[0].mxu1 %vm239_vm2, %v318_v11 }
 0x1ee   : > { %v398_v13 = vpop.f32.mrb[0].mxu1 }
 0x1ef   : > { %v399_v14 = vadd.f32 %v398_v13, %v324_v12  ;;  %v539_v15 = vpop.f32.mrb[1].mxu1 }
 0x1f1   : > { %v402_v16 = vadd.f32 %v399_v14, %v231_v2 }
 0x1f3   : > { %v403_v17 = vmax.f32 %v402_v16, 0.0 }
 0x1f5   : > { %404 = vst [vmem:[%s230_s27] sm:$0xf] %v403_v17 }
 0x1f6   : > { %665 = shalt.err (!%p662_p6)
}
 0x1f7   : > { %s666_s11 = scalar_lea.hbm %s942_s13, 64  ;;  %s670_s28 = scalar_lea.hbm %s1000_s4, 256 }
 0x1f8   : > { %p667_p3 = scmp.ne.s32.totalorder %s942_s13, %s666_s11  ;;  %p671_p1 = scmp.lt.u32.totalorder %s942_s13, %s1000_s4 }
 0x1f9   : > { %p672_p2 = scmp.lt.u32.totalorder %s670_s28, %s666_s11  ;;  %p674_p8 = scmp.lt.u32.totalorder %s666_s11, %s942_s13 }
 0x1fa   : > { %p668_p10 = pnand %p667_p3, %p1011_p9 }
 0x1fb   : > { %p673_p5 = por %p672_p2, %p671_p1 }
 0x1fc   : > { %p669_p11 = pneg %p668_p10 }
 0x1fd   : > { %p675_p12 = por %p674_p8, %p673_p5 }
 0x1ff   : > { %p676_p0 = pnand %p675_p12, %p669_p11 }
 0x201   : > { %679 = shalt.err (!%p676_p0)
}
 0x202   : > { %542 = dma.vmem_to_hbm [thread:$0]  (%p1011_p9), %s944_s23, 64, %s942_s13, %s406_s18  }
 0x203 PF: > { %p553_p7 = scmp.ge.s32.totalorder %s750_s22, 2  ;;  %s433_s27 = sand.u32 1, %s722_s15  }
 0x204   : > { %p1012_p13 = scmp.ne.s32.totalorder %s1007_s8, 0  ;;  %s434_s6 = scalar_lea.sflag [#allocation4], %s433_s27 }
 0x206   : > { %p549_p4 = pnand %p553_p7, %p1012_p13 }
 0x208   : > { %717 = dma.done.wait (!%p549_p4), %s434_s6, 64  }
 0x209   : > { %719 = vsyncadd (!%p549_p4), %s434_s6, 4294967232  ;;  %s20_s22 = sadd.s32 1, %s750_s22   ;;  %s1013_s5 = sld [smem:[#allocation8_spill]] }
 0x20a   : > { %p17_p6 = scmp.ge.s32.totalorder %s20_s22, 6   ;;  %s1014_s15 = smov %s726_s16 }
 0x20b   : > { %s1015_s16 = smov %s730_s17  ;;  %s1016_s17 = smov %s860_s10 }
 0x20c   : > { %s1017_s18 = smov %s742_s20  ;;  %s1018_s19 = smov %s746_s21 }
 0x20d   : > { %s1019_s20 = smov %s1022_s25  ;;  %19 = sbr.rel (!%p17_p6) target bundleno = 7 (0x7), region = 82 }
 0x20f   : > { %s1020_s21 = smov %s1013_s5 }
 0x214   :  { %439 = vsyncpa [#allocation3], 1 }
 0x215   :  { %441 = vsyncpa [#allocation3 + $0x1], 1 }
 0x216   :  { %442 = vsyncpa [#allocation4], 1 }
 0x217   :  { %444 = vsyncpa [#allocation4 + $0x1], 1 }

// kernel: tpu_custom_call.1
= control target key start
LH: loop header
LB: loop body
LE: loop exit
PB: predicated region body
PF: predicated region fallthrough
CT: control target
= control target key end

     0   :  { %9 = vsyncpa [#allocation3], 0  ;;  %s996_s0 = inlined_call_operand.hbm [shape: f32[2,4,256], index: 0, kind: input, shape index: {}]   ;;  %s997_s1 = inlined_call_operand.vmem [shape: f32[4,4], index: 1, kind: input, shape index: {}]   ;;  %s998_s2 = inlined_call_operand.vmem [shape: f32[4,4], index: 2, kind: input, shape index: {}]   ;;  %s999_s3 = inlined_call_operand.vmem [shape: f32[2,4,1], index: 3, kind: input, shape index: {}]   ;;  %s1000_s4 = inlined_call_operand.hbm [shape: f32[2,4,256], index: 4, kind: output, shape index: {}]  }
   0x1   :  { %11 = vsyncpa [#allocation3 + $0x1], 0 }
   0x2   :  { %12 = vsyncpa [#allocation4], 0 }
   0x3   :  { %14 = vsyncpa [#allocation4 + $0x1], 0  ;;  %s782_s15 = smov 0   ;;  %s784_s16 = smov 0  }
   0x4   :  { %s786_s17 = smov 0   ;;  %s788_s18 = smov 0  }
   0x5   :  { %s790_s19 = smov 0   ;;  %s792_s20 = smov 0  }
   0x6   :  { %s794_s21 = smov 0   ;;  %s796_s22 = smov 0  }
   0x7 LB: > { %s506_s23 = sadd.s32 4294967295, %s750_s22   ;;  %s507_s24 = sadd.s32 4294967294, %s750_s22   ;;  %s750_s22 = sphi %s796_s22, %s20_s22   ;;  %s746_s21 = sphi %s794_s21, %s1020_s21   ;;  %s742_s20 = sphi %s792_s20, %s1019_s20   ;;  %s738_s19 = sphi %s790_s19, %s1018_s19   ;;  %s734_s18 = sphi %s788_s18, %s1017_s18   ;;  %s730_s17 = sphi %s786_s17, %s1016_s17   ;;  %s726_s16 = sphi %s784_s16, %s1015_s16   ;;  %s722_s15 = sphi %s782_s15, %s1014_s15  }
   0x8   : > { %s29_s25 = sadd.s32 1, %s742_s20  ;;  %s32_s26 = sadd.s32 1, %s746_s21 }
   0x9   : > { %p30_p0 = scmp.ge.s32.totalorder %s29_s25, 2  ;;  %s41_s27 = sadd.s32 1, %s730_s17 }
   0xa   : > { %p48_p1 = scmp.ne.s32.totalorder %s730_s17, %s726_s16  ;;  %p49_p2 = scmp.eq.s32.totalorder %s750_s22, 0 }
   0xb   : > { %s1022_s25 = smov (%p30_p0, %s29_s25), 0  ;;  %s1024_s26 = smov (!%p30_p0, %s32_s26), %s746_s21 }
   0xc   : > { %s37_s28 = ssub.s32 %s742_s20, %s1022_s25  ;;  %p835_p3 = por %p49_p2, %p48_p1 }
   0xd   : > { %p34_p4 = scmp.ge.s32.totalorder %s1024_s26, 2  ;;  %p54_p5 = scmp.ne.s32.totalorder %s726_s16, %s722_s15 }
   0xe   : > { %p55_p6 = scmp.eq.s32.totalorder %s506_s23, 0  ;;  %p143_p7 = scmp.eq.s32.totalorder %s506_s23, 3 }
   0xf   : > { %s1026_s26 = smov (%p34_p4, %s1024_s26), 0  ;;  %p149_p10 = scmp.eq.s32.totalorder %s507_s24, 3 }
  0x10   : > { %1004 = sst [smem:[#allocation8_spill]] %s1026_s26  ;;  %p843_p8 = por %p55_p6, %p54_p5 }
  0x11   : > { %p847_p9 = por %p143_p7, %p48_p1  ;;  %s36_s6 = ssub.s32 %s746_s21, %s1026_s26 }
  0x12   : > { %s38_s7 = sor.u32 %s37_s28, %s36_s6  ;;  %p853_p12 = por %p149_p10, %p54_p5 }
  0x13   : > { %s1006_s5 = scalar_select %p847_p9, 1, 0 }
  0x14   : > { %p39_p11 = scmp.eq.s32.totalorder %s38_s7, 0  ;;  %p552_p13 = scmp.lt.s32.totalorder %s750_s22, 4 }
  0x15   : > { %s1007_s8 = scalar_select %p853_p12, 1, 0 }
  0x16   : > { %s178_s9 = sand.u32 1, %s730_s17   ;;  %s511_s12 = sshll.u32 %s746_s21, 1 }
  0x17   : > { %s860_s10 = scalar_select %p39_p11, %s730_s17, %s41_s27  }
  0x18   : > { %s510_s11 = sshll.u32 %s178_s9, 2  ;;  %s187_s13 = sadd.s32 %s742_s20, %s511_s12 }
  0x19   : > { %s182_s14 = scalar_lea.vmem [#allocation2], %s510_s11  ;;  %s512_s26 = sshll.u32 %s187_s13, 6 }
  0x1a   : > { %s191_s23 = sshll.u32 %s182_s14, 4  ;;  %s869_s6 = scalar_lea.hbm %s996_s0, %s512_s26  ;;  %s864_s23 = int_to_ptr.vmem [resolvable:$true] %s191_s23 }
  0x1b   : > { %p873_p0 = pnand %p552_p13, %p835_p3  ;;  %s179_s7 = scalar_lea.sflag [#allocation3], %s178_s9 }
  0x1c   : > { %s622_s11 = scalar_lea.hbm %s869_s6, 64  ;;  %s627_s12 = scalar_lea.hbm %s996_s0, 256 }
  0x1d   : > { %p623_p4 = scmp.ne.s32.totalorder %s869_s6, %s622_s11  ;;  %p624_p5 = pneg %p873_p0 }
  0x1e   : > { %p628_p3 = scmp.lt.u32.totalorder %s869_s6, %s996_s0  ;;  %p629_p10 = scmp.lt.u32.totalorder %s627_s12, %s622_s11 }
  0x1f   : > { %p625_p6 = pnand %p624_p5, %p623_p4  ;;  %p631_p13 = scmp.lt.u32.totalorder %s622_s11, %s869_s6 }
  0x20   : > { %p630_p11 = por %p629_p10, %p628_p3 }
  0x21   : > { %p626_p7 = pneg %p625_p6 }
  0x22   : > { %p632_p1 = por %p631_p13, %p630_p11 }
  0x24   : > { %p633_p2 = pnand %p632_p1, %p626_p7 }
  0x26   : > { %636 = shalt.err (!%p633_p2)
}
  0x27   : > { %s637_s9 = scalar_lea.vmem %s864_s23, 64  ;;  %s752_s24 = smov [#allocation2]  }
  0x28   : > { %p638_p4 = scmp.ne.s32.totalorder %s864_s23, %s637_s9  ;;  %s642_s28 = sshll.u32 %s752_s24, 4  ;;  %s643_s28 = int_to_ptr.vmem [resolvable:$false] %s642_s28 }
  0x29   : > { %s644_s26 = scalar_lea.vmem %s643_s28, 128  ;;  %p645_p9 = scmp.lt.s32.totalorder %s864_s23, %s643_s28 }
  0x2a   : > { %p640_p6 = pnand %p638_p4, %p624_p5  ;;  %p646_p3 = scmp.lt.s32.totalorder %s644_s26, %s637_s9 }
  0x2c   : > { %p641_p12 = pneg %p640_p6  ;;  %p647_p10 = por %p646_p3, %p645_p9 }
  0x2e   : > { %p648_p11 = pnand %p647_p10, %p641_p12 }
  0x30   : > { %651 = shalt.err (!%p648_p11)
}
  0x31   : > { %547 = dma.hbm_to_vmem [thread:$0]  (!%p873_p0), %s869_s6, 64, %s864_s23, %s179_s7  }
  0x32   : > { %p1009_p1 = scmp.lt.s32.totalorder %s750_s22, 5  ;;  %p1010_p2 = scmp.ge.s32.totalorder %s750_s22, 1 }
  0x34   : > { %p197_p5 = pnand %p1010_p2, %p1009_p1 }
  0x35   : > { %s909_s11 = sand.u32 (!%p197_p5), 1, %s726_s16  }
  0x36   : > { %200 = sbr.rel (%p197_p5) target bundleno = 515 (0x203), region = 36  ;;  %s514_s29 = sshll.u32 (!%p197_p5), %s909_s11, 2 }
  0x37   : > { %s203_s12 = scalar_lea.sflag (!%p197_p5), [#allocation3], %s909_s11  ;;  %s206_s27 = scalar_lea.vmem (!%p197_p5), [#allocation2], %s514_s29 }
  0x3d   : > { %713 = dma.done.wait (%p843_p8), %s203_s12, 64  }
  0x3e   : > { %715 = vsyncadd (%p843_p8), %s203_s12, 4294967232  ;;  %v753_v0 = vmov 0.0   ;;  %vm754_vm0 = vmmov 0   ;;  %v755_v1 = vmov 0   ;;  %vm243_vm1 = vcmask 1043456   ;;  %s522_s28 = sshll.u32 %s738_s19, 1 }
  0x3f   : > { %530 = vmatprep.subr.mxu0 %v753_v0  ;;  %532 = vmatprep.mubr.msk.f32.mxu0 %vm754_vm0, %v753_v0  ;;  %vm239_vm2 = vcmask 31744   ;;  %v231_v2 = vld [vmem:[%s206_s27] sm:$0xf]  ;;  %s417_s26 = sadd.s32 %s734_s18, %s522_s28  ;;  %s230_s27 = scalar_lea.vmem [#allocation5], %s514_s29 }
  0x40   : > { %621 = vset.pattern.permute.xlu0 %v755_v1  ;;  %535 = vmatprep.subr.mxu1 %v753_v0  ;;  %v232_v3 = vld [vmem:[%s997_s1] sm:$0xf]  ;;  %v518_v5 = vld [vmem:[%s999_s3 + $0x4] sm:$0xf]  ;;  %s523_s12 = sshll.u32 %s417_s26, 6  ;;  %s421_s23 = sshll.u32 %s230_s27, 4  ;;  %s944_s23 = int_to_ptr.vmem [resolvable:$true] %s421_s23 }
  0x41   : > { %537 = vmatprep.mubr.msk.f32.mxu1 %vm754_vm0, %v753_v0  ;;  %v233_v4 = vld [vmem:[%s999_s3] sm:$0xf]  ;;  %531 = vmatpush3.msk.msra.mxu0 %vm243_vm1, %v231_v2  ;;  %s942_s13 = scalar_lea.hbm %s1000_s4, %s523_s12  ;;  %s406_s18 = scalar_lea.sflag [#allocation4], %s909_s11 }
  0x42   : > { %236 = vperm.xlu0 %621, %v233_v4   ;;  %533 = vmatmul.mubr.msk.f32.vlgmr.msra.gmra.mrb[0].mxu0 %vm239_vm2, %v232_v3  ;;  %v318_v11 = vld [vmem:[%s998_s2] sm:$0xf]  ;;  %s652_s19 = scalar_lea.vmem %s944_s23, 64  ;;  %p1011_p9 = scmp.ne.s32.totalorder %s1006_s5, 0 }
  0x43   : > { %p653_p8 = scmp.ne.s32.totalorder %s944_s23, %s652_s19  ;;  %s756_s29 = smov [#allocation5]  }
  0x44   : > { %s656_s30 = sshll.u32 %s756_s29, 4  ;;  %s657_s30 = int_to_ptr.vmem [resolvable:$false] %s656_s30 }
  0x45   : > { %p654_p12 = pnand %p653_p8, %p1011_p9  ;;  %s658_s14 = scalar_lea.vmem %s657_s30, 128 }
  0x46   : > { %323 = vperm.xlu0 %621, %v518_v5   ;;  %p659_p7 = scmp.lt.s32.totalorder %s944_s23, %s657_s30  ;;  %p660_p13 = scmp.lt.s32.totalorder %s658_s14, %s652_s19 }
  0x47   : > { %p655_p0 = pneg %p654_p12 }
  0x48   : > { %p661_p4 = por %p660_p13, %p659_p7 }
  0x4a   : > { %p662_p6 = pnand %p661_p4, %p655_p0 }
  0xc1   : > { %v237_v6 = vpop.permute.xlu0 %236 }
  0xc5   : > { %v324_v12 = vpop.permute.xlu0 %323 }
 0x115   : > { %v313_v7 = vpop.f32.mrb[0].mxu0 }
 0x116   : > { %v314_v8 = vadd.f32 %v313_v7, %v237_v6  ;;  %v534_v9 = vpop.f32.mrb[1].mxu0 }
 0x118   : > { %v317_v10 = vmax.f32 %v314_v8, 0.0 }
 0x11a   : > { %536 = vmatpush3.msk.msra.mxu1 %vm243_vm1, %v317_v10 }
 0x11b   : > { %538 = vmatmul.mubr.msk.f32.vlgmr.msra.gmra.mrb[0].mxu1 %vm239_vm2, %v318_v11 }
 0x1ee   : > { %v398_v13 = vpop.f32.mrb[0].mxu1 }
 0x1ef   : > { %v399_v14 = vadd.f32 %v398_v13, %v324_v12  ;;  %v539_v15 = vpop.f32.mrb[1].mxu1 }
 0x1f1   : > { %v402_v16 = vadd.f32 %v399_v14, %v231_v2 }
 0x1f3   : > { %v403_v17 = vmax.f32 %v402_v16, 0.0 }
 0x1f5   : > { %404 = vst [vmem:[%s230_s27] sm:$0xf] %v403_v17 }
 0x1f6   : > { %665 = shalt.err (!%p662_p6)
}
 0x1f7   : > { %s666_s11 = scalar_lea.hbm %s942_s13, 64  ;;  %s670_s28 = scalar_lea.hbm %s1000_s4, 256 }
 0x1f8   : > { %p667_p3 = scmp.ne.s32.totalorder %s942_s13, %s666_s11  ;;  %p671_p1 = scmp.lt.u32.totalorder %s942_s13, %s1000_s4 }
 0x1f9   : > { %p672_p2 = scmp.lt.u32.totalorder %s670_s28, %s666_s11  ;;  %p674_p8 = scmp.lt.u32.totalorder %s666_s11, %s942_s13 }
 0x1fa   : > { %p668_p10 = pnand %p667_p3, %p1011_p9 }
 0x1fb   : > { %p673_p5 = por %p672_p2, %p671_p1 }
 0x1fc   : > { %p669_p11 = pneg %p668_p10 }
 0x1fd   : > { %p675_p12 = por %p674_p8, %p673_p5 }
 0x1ff   : > { %p676_p0 = pnand %p675_p12, %p669_p11 }
 0x201   : > { %679 = shalt.err (!%p676_p0)
}
 0x202   : > { %542 = dma.vmem_to_hbm [thread:$0]  (%p1011_p9), %s944_s23, 64, %s942_s13, %s406_s18  }
 0x203 PF: > { %p553_p7 = scmp.ge.s32.totalorder %s750_s22, 2  ;;  %s433_s27 = sand.u32 1, %s722_s15  }
 0x204   : > { %p1012_p13 = scmp.ne.s32.totalorder %s1007_s8, 0  ;;  %s434_s6 = scalar_lea.sflag [#allocation4], %s433_s27 }
 0x206   : > { %p549_p4 = pnand %p553_p7, %p1012_p13 }
 0x208   : > { %717 = dma.done.wait (!%p549_p4), %s434_s6, 64  }
 0x209   : > { %719 = vsyncadd (!%p549_p4), %s434_s6, 4294967232  ;;  %s20_s22 = sadd.s32 1, %s750_s22   ;;  %s1013_s5 = sld [smem:[#allocation8_spill]] }
 0x20a   : > { %p17_p6 = scmp.ge.s32.totalorder %s20_s22, 6   ;;  %s1014_s15 = smov %s726_s16 }
 0x20b   : > { %s1015_s16 = smov %s730_s17  ;;  %s1016_s17 = smov %s860_s10 }
 0x20c   : > { %s1017_s18 = smov %s742_s20  ;;  %s1018_s19 = smov %s746_s21 }
 0x20d   : > { %s1019_s20 = smov %s1022_s25  ;;  %19 = sbr.rel (!%p17_p6) target bundleno = 7 (0x7), region = 82 }
 0x20f   : > { %s1020_s21 = smov %s1013_s5 }
 0x214   :  { %439 = vsyncpa [#allocation3], 1 }
 0x215   :  { %441 = vsyncpa [#allocation3 + $0x1], 1 }
 0x216   :  { %442 = vsyncpa [#allocation4], 1 }
 0x217   :  { %444 = vsyncpa [#allocation4 + $0x1], 1 }

</bundles_post_ra>
